<compile_context>
chip_gen: v7x
topology: tpu7x:2x2x1
jax: 0.10.0
libtpu: 0.0.40
codegen_flags: <defaults>
</compile_context>

<pallas_src>
import functools
import numpy as np

import jax
import jax.numpy as jnp
from jax.experimental import pallas as pl
from jax.experimental.pallas import tpu as pltpu


def _round_up(x, m):
    return ((x + m - 1) // m) * m


# --------------------------- Pallas kernels ---------------------------------

def _fused_head_kernel(rows_ref,
                       bbo_w, bbo_b, bba_w, bba_b,
                       aspp_w, aspp_b, proj_w, proj_b,
                       cls_w, aux_w, tail_b, g_ref,
                       o_ref, *, cdt):
    """One M-tile of the fused per-row head.

    rows_ref : [TM, Kp]   (compute dtype, zero-padded input channels)
    weights  : resident in VMEM (block index constant across the grid)
    o_ref    : [TM, OUT_W] f32 slab:
                 cols [0, 3*pd)            = L2-normalized ASPP branches 1..3
                 cols [3*pd, 3*pd+nc)      = classifier logits
                 cols [3*pd+nc, 3*pd+2*nc) = aux classifier logits
                 remaining cols            = zero padding (lane-dense store)
    """
    f32 = jnp.float32
    rows = rows_ref[...]

    # backbone 1x1 convs (+ReLU); f32 accumulation, f32 epilogue
    feat_out = jnp.maximum(
        jnp.dot(rows, bbo_w[...], preferred_element_type=f32) + bbo_b[...], 0.0)
    feat_aux = jnp.maximum(
        jnp.dot(rows, bba_w[...], preferred_element_type=f32) + bba_b[...], 0.0)

    # fused 3-branch ASPP, written lane-dense into an OUT_W-wide slab
    a_ext = jnp.maximum(
        jnp.dot(feat_out.astype(cdt), aspp_w[...],
                preferred_element_type=f32) + aspp_b[...], 0.0)

    # fuse/projection over the concatenated branches (padding cols are zero)
    proj = jnp.maximum(
        jnp.dot(a_ext.astype(cdt), proj_w[...],
                preferred_element_type=f32) + proj_b[...], 0.0)

    # classifier + aux classifier placed into their (zero-padded) columns
    tail = (jnp.dot(proj.astype(cdt), cls_w[...], preferred_element_type=f32)
            + jnp.dot(feat_aux.astype(cdt), aux_w[...],
                      preferred_element_type=f32)
            + tail_b[...])

    # per-branch L2 normalization: the block-diagonal ones-matrix matmul gives
    # every column its branch's sum of squares (zero for tail/pad columns).
    # rsqrt(max(ss, eps^2)) == 1 / max(||x||, eps)  (F.normalize semantics).
    ss = jnp.dot(a_ext * a_ext, g_ref[...], preferred_element_type=f32)
    inv = jax.lax.rsqrt(jnp.maximum(ss, 1e-24))

    o_ref[...] = (a_ext * inv + tail).astype(o_ref.dtype)


def fused_head(rows, kparams, *, out_w, compute_dtype=jnp.bfloat16, tm_max=1024):
    """rows: [M, Kp] f32 channels-last rows.  Returns [M, out_w] f32 slab."""
    M, Kp = rows.shape
    TM = min(tm_max, _round_up(M, 8))
    Mp = _round_up(M, TM)
    if Mp != M:
        rows = jnp.pad(rows, ((0, Mp - M), (0, 0)))
    rows = rows.astype(compute_dtype)

    weights = [kparams['bbo_w'], kparams['bbo_b'],
               kparams['bba_w'], kparams['bba_b'],
               kparams['aspp_w'], kparams['aspp_b'],
               kparams['proj_w'], kparams['proj_b'],
               kparams['cls_w'], kparams['aux_w'],
               kparams['tail_b'], kparams['g']]

    in_specs = [pl.BlockSpec((TM, Kp), lambda i: (i, 0))]
    in_specs += [pl.BlockSpec(w.shape, lambda i: (0, 0)) for w in weights]

    slab = pl.pallas_call(
        functools.partial(_fused_head_kernel, cdt=compute_dtype),
        grid=(Mp // TM,),
        in_specs=in_specs,
        out_specs=pl.BlockSpec((TM, out_w), lambda i: (i, 0)),
        out_shape=jax.ShapeDtypeStruct((Mp, out_w), jnp.float32),
        compiler_params=pltpu.CompilerParams(
            dimension_semantics=("parallel",)),
    )(rows, *weights)
    return slab[:M]


def _bilinear_kernel(x_ref, wh_ref, wwT_ref, o_ref):
    """Separable bilinear resize of a block of planes via batched einsums."""
    x = x_ref[...]                                             # [PT, h, w]
    pt = x.shape[0]
    wwT = jnp.broadcast_to(wwT_ref[...], (pt,) + wwT_ref.shape)  # [PT, w, Wo]
    wh = jnp.broadcast_to(wh_ref[...], (pt,) + wh_ref.shape)     # [PT, Ho, h]
    t = jnp.einsum('phw,pwW->phW', x, wwT,
                   preferred_element_type=jnp.float32)          # [PT, h, Wo]
    y = jnp.einsum('pHh,phW->pHW', wh, t,
                   preferred_element_type=jnp.float32)          # [PT, Ho, Wo]
    o_ref[...] = y.astype(o_ref.dtype)


def bilinear_resize_planes(planes, wh, wwT, *, pt_max=8):
    """planes: [P, h, w] -> [P, Ho, Wo] bilinear (align_corners=False)."""
    P, h, w = planes.shape
    Ho, Wo = wh.shape[0], wwT.shape[1]
    PT = min(pt_max, P)
    Pp = _round_up(P, PT)
    if Pp != P:
        planes = jnp.pad(planes, ((0, Pp - P), (0, 0), (0, 0)))
    out = pl.pallas_call(
        _bilinear_kernel,
        grid=(Pp // PT,),
        in_specs=[pl.BlockSpec((PT, h, w), lambda i: (i, 0, 0)),
                  pl.BlockSpec((Ho, h), lambda i: (0, 0)),
                  pl.BlockSpec((w, Wo), lambda i: (0, 0))],
        out_specs=pl.BlockSpec((PT, Ho, Wo), lambda i: (i, 0, 0)),
        out_shape=jax.ShapeDtypeStruct((Pp, Ho, Wo), planes.dtype),
        compiler_params=pltpu.CompilerParams(
            dimension_semantics=("parallel",)),
    )(planes, wh, wwT)
    return out[:P]


# ------------------------------ JAX glue -------------------------------------

def bilinear_weight_matrix(out_size, in_size):
    """Row-interpolation matrix reproducing F.interpolate(mode='bilinear',
    align_corners=False) along one axis."""
    scale = in_size / out_size
    i = np.arange(out_size, dtype=np.float64)
    src = np.maximum((i + 0.5) * scale - 0.5, 0.0)
    p0 = np.minimum(np.floor(src).astype(np.int64), in_size - 1)
    p1 = np.minimum(p0 + 1, in_size - 1)
    w1 = src - p0
    w0 = 1.0 - w1
    Wm = np.zeros((out_size, in_size), dtype=np.float32)
    Wm[np.arange(out_size), p0] += w0
    Wm[np.arange(out_size), p1] += w1
    return jnp.asarray(Wm)


class DeepLabV3Pallas:
    """Synthetic DeepLabV3: the abstract `backbone` / `classifier` constructor
    args are realized as a stride-2 1x1-conv feature extractor and an
    ASPP-style head (3 projected branches + fuse + classifier), which is what
    the reference forward pass consumes ('out', 'aspp', 'aux')."""

    def __init__(self, key, in_ch=4, feat_ch=32, aux_ch=16, project_dim=32,
                 num_classes=1, memory_size=8, contrast=True, use_aux=True,
                 compute_dtype=jnp.bfloat16):
        self.contrast = contrast
        self.use_aux = use_aux
        self.num_classes = num_classes
        self.project_dim = project_dim
        self.compute_dtype = compute_dtype
        ks = jax.random.split(key, 24)

        def init(k, shape, scale=0.1):
            return jax.random.normal(k, shape, jnp.float32) * scale

        p = {}
        # backbone
        p['bb_out_w'] = init(ks[0], (in_ch, feat_ch));  p['bb_out_b'] = init(ks[1], (feat_ch,))
        p['bb_aux_w'] = init(ks[2], (in_ch, aux_ch));   p['bb_aux_b'] = init(ks[3], (aux_ch,))
        # ASPP branches (projected to project_dim)
        p['aspp1_w'] = init(ks[4], (feat_ch, project_dim)); p['aspp1_b'] = init(ks[5], (project_dim,))
        p['aspp2_w'] = init(ks[6], (feat_ch, project_dim)); p['aspp2_b'] = init(ks[7], (project_dim,))
        p['aspp3_w'] = init(ks[8], (feat_ch, project_dim)); p['aspp3_b'] = init(ks[9], (project_dim,))
        # fuse + classifier
        p['proj_w'] = init(ks[10], (3 * project_dim, project_dim)); p['proj_b'] = init(ks[11], (project_dim,))
        p['cls_w'] = init(ks[12], (project_dim, num_classes));      p['cls_b'] = init(ks[13], (num_classes,))
        # aux classifier
        p['auxcls_w'] = init(ks[14], (aux_ch, num_classes)); p['auxcls_b'] = init(ks[15], (num_classes,))
        self.p = p

        # ---- kernel-ready fused / padded weights (built once) --------------
        Kp = max(8, _round_up(in_ch, 8))                 # padded contraction dim
        OUT_W = _round_up(3 * project_dim + 2 * num_classes, 128)  # lane-dense
        self.Kp, self.OUT_W = Kp, OUT_W
        base = 3 * project_dim
        cdt = compute_dtype

        def pad_rows(w, nrows):
            return jnp.zeros((nrows, w.shape[1]), jnp.float32).at[:w.shape[0], :].set(w)

        k = {}
        k['bbo_w'] = pad_rows(p['bb_out_w'], Kp).astype(cdt)
        k['bbo_b'] = p['bb_out_b'].reshape(1, -1)
        k['bba_w'] = pad_rows(p['bb_aux_w'], Kp).astype(cdt)
        k['bba_b'] = p['bb_aux_b'].reshape(1, -1)

        aspp_w = jnp.concatenate([p['aspp1_w'], p['aspp2_w'], p['aspp3_w']], axis=1)
        aspp_b = jnp.concatenate([p['aspp1_b'], p['aspp2_b'], p['aspp3_b']])
        k['aspp_w'] = (jnp.zeros((feat_ch, OUT_W), jnp.float32)
                       .at[:, :base].set(aspp_w).astype(cdt))
        k['aspp_b'] = jnp.zeros((1, OUT_W), jnp.float32).at[0, :base].set(aspp_b)

        k['proj_w'] = (jnp.zeros((OUT_W, project_dim), jnp.float32)
                       .at[:base, :].set(p['proj_w']).astype(cdt))
        k['proj_b'] = p['proj_b'].reshape(1, -1)

        k['cls_w'] = (jnp.zeros((project_dim, OUT_W), jnp.float32)
                      .at[:, base:base + num_classes].set(p['cls_w']).astype(cdt))
        k['aux_w'] = (jnp.zeros((aux_ch, OUT_W), jnp.float32)
                      .at[:, base + num_classes:base + 2 * num_classes]
                      .set(p['auxcls_w']).astype(cdt))
        tail_b = jnp.zeros((1, OUT_W), jnp.float32)
        tail_b = tail_b.at[0, base:base + num_classes].set(p['cls_b'])
        tail_b = tail_b.at[0, base + num_classes:base + 2 * num_classes].set(p['auxcls_b'])
        k['tail_b'] = tail_b

        # block-diagonal group-sum matrix for per-branch L2 normalization
        g = np.zeros((OUT_W, OUT_W), np.float32)
        for br in range(3):
            s = br * project_dim
            g[s:s + project_dim, s:s + project_dim] = 1.0
        k['g'] = jnp.asarray(g)
        self.k = k

        # register_buffer equivalents (memory banks; unused in forward)
        if contrast and memory_size > 0:
            for i, kk in zip((1, 2, 3), (ks[16], ks[17], ks[18])):
                q = jax.random.normal(kk, (num_classes, memory_size, project_dim), jnp.float32)
                q = q / jnp.maximum(jnp.linalg.norm(q, axis=2, keepdims=True), 1e-12)
                setattr(self, f'encode{i}_queue', q)
                setattr(self, f'encode{i}_queue_ptr', jnp.zeros((num_classes,), jnp.int32))
                setattr(self, f'code{i}_queue_label',
                        jax.random.normal(ks[18 + i], (num_classes, memory_size), jnp.float32))

    def __call__(self, x, target=None, is_eval=False):
        N, Cin, H, W = x.shape
        pdim, nc = self.project_dim, self.num_classes
        base = 3 * pdim

        # ---- channels-last once; stride-2 "backbone" downsample -------------
        x_nhwc = jnp.transpose(x, (0, 2, 3, 1))
        xd = x_nhwc[:, ::2, ::2, :]
        n, h, w, _ = xd.shape
        rows = xd.reshape(n * h * w, Cin)
        if self.Kp != Cin:
            rows = jnp.pad(rows, ((0, 0), (0, self.Kp - Cin)))

        # ---- single fused per-row head kernel --------------------------------
        slab = fused_head(rows, self.k, out_w=self.OUT_W,
                          compute_dtype=self.compute_dtype)        # [M, OUT_W]

        logits = slab[:, base:base + nc]                            # [M, nc]
        aux_logits = slab[:, base + nc:base + 2 * nc]               # [M, nc]

        # ---- batched bilinear upsample ('out' + 'aux' in one call) -----------
        wh = bilinear_weight_matrix(H, h)
        wwT = bilinear_weight_matrix(W, w).T

        def to_planes(r):                                           # [M,nc]->[n*nc,h,w]
            return jnp.transpose(r.reshape(n, h, w, nc), (0, 3, 1, 2)).reshape(n * nc, h, w)

        planes = jnp.concatenate([to_planes(logits), to_planes(aux_logits)], axis=0)
        up = bilinear_resize_planes(planes, wh, wwT)                # [2*n*nc, H, W]
        out_up = up[:n * nc].reshape(n, nc, H, W)
        aux_up = up[n * nc:].reshape(n, nc, H, W)

        result = {}
        result['out'] = out_up

        if self.contrast and is_eval is False:
            def branch_nchw(lo):
                return jnp.transpose(slab[:, lo:lo + pdim].reshape(n, h, w, pdim),
                                     (0, 3, 1, 2))
            aspp_one = branch_nchw(0)
            aspp_two = branch_nchw(pdim)
            aspp_three = branch_nchw(2 * pdim)
            result['L1'] = [aspp_one, aspp_two]
            result['L2'] = [aspp_two, aspp_three]
            result['L3'] = [aspp_three, aspp_one]

        if self.use_aux:
            result['aux'] = aux_up

        return result


# ------------------------------- main ----------------------------------------

if __name__ == "__main__":
    key = jax.random.PRNGKey(0)
    k_param, k_data = jax.random.split(key)

    x = jax.random.normal(k_data, (2, 4, 16, 16), dtype=jnp.float32)   # NCHW
    model = DeepLabV3Pallas(k_param, in_ch=4, feat_ch=32, aux_ch=16,
                            project_dim=32, num_classes=1, memory_size=8,
                            contrast=True, use_aux=True)

    result = model(x, is_eval=False)
    jax.block_until_ready(jax.tree_util.tree_leaves(result))

    # sanity (shapes only; no printing beyond the success token)
    assert result['out'].shape == (2, 1, 16, 16)
    assert result['aux'].shape == (2, 1, 16, 16)
    assert result['L1'][0].shape == (2, 32, 8, 8)

    print("KERNEL_OK")
</pallas_src>

<mosaic_0001>
module attributes {stable_mosaic.version = 11 : i64} {
  func.func @_fused_head_kernel(%arg0: i32, %arg1: memref<128x8xbf16, #tpu.memory_space<vmem>>, %arg2: memref<8x32xbf16, #tpu.memory_space<vmem>>, %arg3: memref<1x32xf32, #tpu.memory_space<vmem>>, %arg4: memref<8x16xbf16, #tpu.memory_space<vmem>>, %arg5: memref<1x16xf32, #tpu.memory_space<vmem>>, %arg6: memref<32x128xbf16, #tpu.memory_space<vmem>>, %arg7: memref<1x128xf32, #tpu.memory_space<vmem>>, %arg8: memref<128x32xbf16, #tpu.memory_space<vmem>>, %arg9: memref<1x32xf32, #tpu.memory_space<vmem>>, %arg10: memref<32x128xbf16, #tpu.memory_space<vmem>>, %arg11: memref<16x128xbf16, #tpu.memory_space<vmem>>, %arg12: memref<1x128xf32, #tpu.memory_space<vmem>>, %arg13: memref<128x128xf32, #tpu.memory_space<vmem>>, %arg14: memref<128x128xf32, #tpu.memory_space<vmem>>) attributes {dimension_semantics = [#tpu.dimension_semantics<parallel>], iteration_bounds = array<i64: 1>, scalar_prefetch = 0 : i64, scratch_operands = 0 : i64, tpu.core_type = #tpu.core_type<tc>, window_params = [{transform_indices = @transform_0, window_bounds = array<i64: 128, 8>}, {pipeline_mode = #tpu.pipeline_mode<synchronous>, transform_indices = @transform_1, window_bounds = array<i64: 8, 32>}, {pipeline_mode = #tpu.pipeline_mode<synchronous>, transform_indices = @transform_2, window_bounds = array<i64: 1, 32>}, {pipeline_mode = #tpu.pipeline_mode<synchronous>, transform_indices = @transform_3, window_bounds = array<i64: 8, 16>}, {pipeline_mode = #tpu.pipeline_mode<synchronous>, transform_indices = @transform_4, window_bounds = array<i64: 1, 16>}, {pipeline_mode = #tpu.pipeline_mode<synchronous>, transform_indices = @transform_5, window_bounds = array<i64: 32, 128>}, {pipeline_mode = #tpu.pipeline_mode<synchronous>, transform_indices = @transform_6, window_bounds = array<i64: 1, 128>}, {pipeline_mode = #tpu.pipeline_mode<synchronous>, transform_indices = @transform_7, window_bounds = array<i64: 128, 32>}, {pipeline_mode = #tpu.pipeline_mode<synchronous>, transform_indices = @transform_8, window_bounds = array<i64: 1, 32>}, {pipeline_mode = #tpu.pipeline_mode<synchronous>, transform_indices = @transform_9, window_bounds = array<i64: 32, 128>}, {pipeline_mode = #tpu.pipeline_mode<synchronous>, transform_indices = @transform_10, window_bounds = array<i64: 16, 128>}, {pipeline_mode = #tpu.pipeline_mode<synchronous>, transform_indices = @transform_11, window_bounds = array<i64: 1, 128>}, {pipeline_mode = #tpu.pipeline_mode<synchronous>, transform_indices = @transform_12, window_bounds = array<i64: 128, 128>}, {transform_indices = @transform_13, window_bounds = array<i64: 128, 128>}]} {
    %c0 = arith.constant 0 : index
    %c0_0 = arith.constant 0 : index
    %0 = vector.load %arg1[%c0, %c0_0] : memref<128x8xbf16, #tpu.memory_space<vmem>>, vector<128x8xbf16>
    %c0_1 = arith.constant 0 : index
    %c0_2 = arith.constant 0 : index
    %1 = vector.load %arg2[%c0_1, %c0_2] : memref<8x32xbf16, #tpu.memory_space<vmem>>, vector<8x32xbf16>
    %cst = arith.constant dense<0.000000e+00> : vector<128x32xf32>
    %2 = tpu.matmul %0, %1, %cst {dimension_numbers = #tpu.dot_dimension_numbers<[1], [0], [0], [1], [0, 0, 1, 1], [], []>} : vector<128x8xbf16>, vector<8x32xbf16>, vector<128x32xf32> -> vector<128x32xf32>
    %c0_3 = arith.constant 0 : index
    %c0_4 = arith.constant 0 : index
    %3 = vector.load %arg3[%c0_3, %c0_4] : memref<1x32xf32, #tpu.memory_space<vmem>>, vector<1x32xf32>
    %4 = vector.broadcast %3 : vector<1x32xf32> to vector<128x32xf32>
    %5 = arith.addf %2, %4 : vector<128x32xf32>
    %cst_5 = arith.constant 0.000000e+00 : f32
    %6 = vector.broadcast %cst_5 : f32 to vector<128x32xf32>
    %7 = arith.maximumf %5, %6 : vector<128x32xf32>
    %c0_6 = arith.constant 0 : index
    %c0_7 = arith.constant 0 : index
    %8 = vector.load %arg4[%c0_6, %c0_7] : memref<8x16xbf16, #tpu.memory_space<vmem>>, vector<8x16xbf16>
    %cst_8 = arith.constant dense<0.000000e+00> : vector<128x16xf32>
    %9 = tpu.matmul %0, %8, %cst_8 {dimension_numbers = #tpu.dot_dimension_numbers<[1], [0], [0], [1], [0, 0, 1, 1], [], []>} : vector<128x8xbf16>, vector<8x16xbf16>, vector<128x16xf32> -> vector<128x16xf32>
    %c0_9 = arith.constant 0 : index
    %c0_10 = arith.constant 0 : index
    %10 = vector.load %arg5[%c0_9, %c0_10] : memref<1x16xf32, #tpu.memory_space<vmem>>, vector<1x16xf32>
    %11 = vector.broadcast %10 : vector<1x16xf32> to vector<128x16xf32>
    %12 = arith.addf %9, %11 : vector<128x16xf32>
    %cst_11 = arith.constant 0.000000e+00 : f32
    %13 = vector.broadcast %cst_11 : f32 to vector<128x16xf32>
    %14 = arith.maximumf %12, %13 : vector<128x16xf32>
    %15 = arith.truncf %7 : vector<128x32xf32> to vector<128x32xbf16>
    %c0_12 = arith.constant 0 : index
    %c0_13 = arith.constant 0 : index
    %16 = vector.load %arg6[%c0_12, %c0_13] : memref<32x128xbf16, #tpu.memory_space<vmem>>, vector<32x128xbf16>
    %cst_14 = arith.constant dense<0.000000e+00> : vector<128x128xf32>
    %17 = tpu.matmul %15, %16, %cst_14 {dimension_numbers = #tpu.dot_dimension_numbers<[1], [0], [0], [1], [0, 0, 1, 1], [], []>} : vector<128x32xbf16>, vector<32x128xbf16>, vector<128x128xf32> -> vector<128x128xf32>
    %c0_15 = arith.constant 0 : index
    %c0_16 = arith.constant 0 : index
    %18 = vector.load %arg7[%c0_15, %c0_16] : memref<1x128xf32, #tpu.memory_space<vmem>>, vector<1x128xf32>
    %19 = vector.broadcast %18 : vector<1x128xf32> to vector<128x128xf32>
    %20 = arith.addf %17, %19 : vector<128x128xf32>
    %cst_17 = arith.constant 0.000000e+00 : f32
    %21 = vector.broadcast %cst_17 : f32 to vector<128x128xf32>
    %22 = arith.maximumf %20, %21 : vector<128x128xf32>
    %23 = arith.truncf %22 : vector<128x128xf32> to vector<128x128xbf16>
    %c0_18 = arith.constant 0 : index
    %c0_19 = arith.constant 0 : index
    %24 = vector.load %arg8[%c0_18, %c0_19] : memref<128x32xbf16, #tpu.memory_space<vmem>>, vector<128x32xbf16>
    %cst_20 = arith.constant dense<0.000000e+00> : vector<128x32xf32>
    %25 = tpu.matmul %23, %24, %cst_20 {dimension_numbers = #tpu.dot_dimension_numbers<[1], [0], [0], [1], [0, 0, 1, 1], [], []>} : vector<128x128xbf16>, vector<128x32xbf16>, vector<128x32xf32> -> vector<128x32xf32>
    %c0_21 = arith.constant 0 : index
    %c0_22 = arith.constant 0 : index
    %26 = vector.load %arg9[%c0_21, %c0_22] : memref<1x32xf32, #tpu.memory_space<vmem>>, vector<1x32xf32>
    %27 = vector.broadcast %26 : vector<1x32xf32> to vector<128x32xf32>
    %28 = arith.addf %25, %27 : vector<128x32xf32>
    %cst_23 = arith.constant 0.000000e+00 : f32
    %29 = vector.broadcast %cst_23 : f32 to vector<128x32xf32>
    %30 = arith.maximumf %28, %29 : vector<128x32xf32>
    %31 = arith.truncf %30 : vector<128x32xf32> to vector<128x32xbf16>
    %c0_24 = arith.constant 0 : index
    %c0_25 = arith.constant 0 : index
    %32 = vector.load %arg10[%c0_24, %c0_25] : memref<32x128xbf16, #tpu.memory_space<vmem>>, vector<32x128xbf16>
    %cst_26 = arith.constant dense<0.000000e+00> : vector<128x128xf32>
    %33 = tpu.matmul %31, %32, %cst_26 {dimension_numbers = #tpu.dot_dimension_numbers<[1], [0], [0], [1], [0, 0, 1, 1], [], []>} : vector<128x32xbf16>, vector<32x128xbf16>, vector<128x128xf32> -> vector<128x128xf32>
    %34 = arith.truncf %14 : vector<128x16xf32> to vector<128x16xbf16>
    %c0_27 = arith.constant 0 : index
    %c0_28 = arith.constant 0 : index
    %35 = vector.load %arg11[%c0_27, %c0_28] : memref<16x128xbf16, #tpu.memory_space<vmem>>, vector<16x128xbf16>
    %cst_29 = arith.constant dense<0.000000e+00> : vector<128x128xf32>
    %36 = tpu.matmul %34, %35, %cst_29 {dimension_numbers = #tpu.dot_dimension_numbers<[1], [0], [0], [1], [0, 0, 1, 1], [], []>} : vector<128x16xbf16>, vector<16x128xbf16>, vector<128x128xf32> -> vector<128x128xf32>
    %37 = arith.addf %33, %36 : vector<128x128xf32>
    %c0_30 = arith.constant 0 : index
    %c0_31 = arith.constant 0 : index
    %38 = vector.load %arg12[%c0_30, %c0_31] : memref<1x128xf32, #tpu.memory_space<vmem>>, vector<1x128xf32>
    %39 = vector.broadcast %38 : vector<1x128xf32> to vector<128x128xf32>
    %40 = arith.addf %37, %39 : vector<128x128xf32>
    %41 = arith.mulf %22, %22 : vector<128x128xf32>
    %c0_32 = arith.constant 0 : index
    %c0_33 = arith.constant 0 : index
    %42 = vector.load %arg13[%c0_32, %c0_33] : memref<128x128xf32, #tpu.memory_space<vmem>>, vector<128x128xf32>
    %cst_34 = arith.constant dense<0.000000e+00> : vector<128x128xf32>
    %43 = tpu.matmul %41, %42, %cst_34 {dimension_numbers = #tpu.dot_dimension_numbers<[1], [0], [0], [1], [0, 0, 1, 1], [], []>} : vector<128x128xf32>, vector<128x128xf32>, vector<128x128xf32> -> vector<128x128xf32>
    %cst_35 = arith.constant 1.000000e-24 : f32
    %44 = vector.broadcast %cst_35 : f32 to vector<128x128xf32>
    %45 = arith.maximumf %43, %44 : vector<128x128xf32>
    %46 = math.rsqrt %45 : vector<128x128xf32>
    %47 = arith.mulf %22, %46 : vector<128x128xf32>
    %48 = arith.addf %47, %40 : vector<128x128xf32>
    %c0_36 = arith.constant 0 : index
    %c0_37 = arith.constant 0 : index
    %49 = vector.load %arg14[%c0_36, %c0_37] : memref<128x128xf32, #tpu.memory_space<vmem>>, vector<128x128xf32>
    tpu.vector_store %arg14[%c0_36, %c0_37], %48 {strides = array<i32>} : memref<128x128xf32, #tpu.memory_space<vmem>>, vector<128x128xf32>,
    return
  }
  func.func @transform_0(%arg0: i32) -> (i32, i32) {
    %c0_i32 = arith.constant 0 : i32
    %c0_i32_0 = arith.constant 0 : i32
    return %arg0, %c0_i32 : i32, i32
  }
  func.func @transform_1(%arg0: i32) -> (i32, i32) {
    %c0_i32 = arith.constant 0 : i32
    %c0_i32_0 = arith.constant 0 : i32
    %c0_i32_1 = arith.constant 0 : i32
    return %c0_i32, %c0_i32_0 : i32, i32
  }
  func.func @transform_2(%arg0: i32) -> (i32, i32) {
    %c0_i32 = arith.constant 0 : i32
    %c0_i32_0 = arith.constant 0 : i32
    %c0_i32_1 = arith.constant 0 : i32
    return %c0_i32, %c0_i32_0 : i32, i32
  }
  func.func @transform_3(%arg0: i32) -> (i32, i32) {
    %c0_i32 = arith.constant 0 : i32
    %c0_i32_0 = arith.constant 0 : i32
    %c0_i32_1 = arith.constant 0 : i32
    return %c0_i32, %c0_i32_0 : i32, i32
  }
  func.func @transform_4(%arg0: i32) -> (i32, i32) {
    %c0_i32 = arith.constant 0 : i32
    %c0_i32_0 = arith.constant 0 : i32
    %c0_i32_1 = arith.constant 0 : i32
    return %c0_i32, %c0_i32_0 : i32, i32
  }
  func.func @transform_5(%arg0: i32) -> (i32, i32) {
    %c0_i32 = arith.constant 0 : i32
    %c0_i32_0 = arith.constant 0 : i32
    %c0_i32_1 = arith.constant 0 : i32
    return %c0_i32, %c0_i32_0 : i32, i32
  }
  func.func @transform_6(%arg0: i32) -> (i32, i32) {
    %c0_i32 = arith.constant 0 : i32
    %c0_i32_0 = arith.constant 0 : i32
    %c0_i32_1 = arith.constant 0 : i32
    return %c0_i32, %c0_i32_0 : i32, i32
  }
  func.func @transform_7(%arg0: i32) -> (i32, i32) {
    %c0_i32 = arith.constant 0 : i32
    %c0_i32_0 = arith.constant 0 : i32
    %c0_i32_1 = arith.constant 0 : i32
    return %c0_i32, %c0_i32_0 : i32, i32
  }
  func.func @transform_8(%arg0: i32) -> (i32, i32) {
    %c0_i32 = arith.constant 0 : i32
    %c0_i32_0 = arith.constant 0 : i32
    %c0_i32_1 = arith.constant 0 : i32
    return %c0_i32, %c0_i32_0 : i32, i32
  }
  func.func @transform_9(%arg0: i32) -> (i32, i32) {
    %c0_i32 = arith.constant 0 : i32
    %c0_i32_0 = arith.constant 0 : i32
    %c0_i32_1 = arith.constant 0 : i32
    return %c0_i32, %c0_i32_0 : i32, i32
  }
  func.func @transform_10(%arg0: i32) -> (i32, i32) {
    %c0_i32 = arith.constant 0 : i32
    %c0_i32_0 = arith.constant 0 : i32
    %c0_i32_1 = arith.constant 0 : i32
    return %c0_i32, %c0_i32_0 : i32, i32
  }
  func.func @transform_11(%arg0: i32) -> (i32, i32) {
    %c0_i32 = arith.constant 0 : i32
    %c0_i32_0 = arith.constant 0 : i32
    %c0_i32_1 = arith.constant 0 : i32
    return %c0_i32, %c0_i32_0 : i32, i32
  }
  func.func @transform_12(%arg0: i32) -> (i32, i32) {
    %c0_i32 = arith.constant 0 : i32
    %c0_i32_0 = arith.constant 0 : i32
    %c0_i32_1 = arith.constant 0 : i32
    return %c0_i32, %c0_i32_0 : i32, i32
  }
  func.func @transform_13(%arg0: i32) -> (i32, i32) {
    %c0_i32 = arith.constant 0 : i32
    %c0_i32_0 = arith.constant 0 : i32
    return %arg0, %c0_i32 : i32, i32
  }
}

</mosaic_0001>

<bundles_post_ra>
// kernel: tpu_custom_call.1
= control target key start
LH: loop header
LB: loop body
LE: loop exit
PB: predicated region body
PF: predicated region fallthrough
CT: control target
= control target key end

     0   :  { %vm135_vm0 = vcmask 1043456   ;;  %vm110_vm1 = vcmask 64512   ;;  %s2202_s0 = inlined_call_operand.vmem [shape: bf16[128,8], index: 0, kind: input, shape index: {}]   ;;  %s2203_s1 = inlined_call_operand.vmem [shape: bf16[8,32], index: 1, kind: input, shape index: {}]   ;;  %s2204_s2 = inlined_call_operand.vmem [shape: f32[1,32], index: 2, kind: input, shape index: {}]   ;;  %s2205_s3 = inlined_call_operand.vmem [shape: bf16[8,16], index: 3, kind: input, shape index: {}]   ;;  %s2206_s4 = inlined_call_operand.vmem [shape: f32[1,16], index: 4, kind: input, shape index: {}]   ;;  %s2207_s5 = inlined_call_operand.vmem [shape: bf16[32,128], index: 5, kind: input, shape index: {}]   ;;  %s2208_s6 = inlined_call_operand.vmem [shape: f32[1,128], index: 6, kind: input, shape index: {}]   ;;  %s2209_s7 = inlined_call_operand.vmem [shape: bf16[128,32], index: 7, kind: input, shape index: {}]   ;;  %s2210_s8 = inlined_call_operand.vmem [shape: f32[1,32], index: 8, kind: input, shape index: {}]   ;;  %s2211_s9 = inlined_call_operand.vmem [shape: bf16[32,128], index: 9, kind: input, shape index: {}]   ;;  %s2212_s10 = inlined_call_operand.vmem [shape: bf16[16,128], index: 10, kind: input, shape index: {}]   ;;  %s2213_s11 = inlined_call_operand.vmem [shape: f32[1,128], index: 11, kind: input, shape index: {}]   ;;  %s2214_s12 = inlined_call_operand.vmem [shape: f32[128,128], index: 12, kind: input, shape index: {}]   ;;  %s2215_s13 = inlined_call_operand.hbm [shape: f32[128,128], index: 13, kind: output, shape index: {}]  }
   0x1   :  { %v62_v0 = vld [vmem:[%s2203_s1] sm:$0xf]  ;;  %v1716_v3 = vld [vmem:[%s2202_s0 + $0x8] sm:$0xff]   ;;  %v1717_v4 = vld [vmem:[%s2202_s0 + $0x10] sm:$0xff]  }
   0x2   :  { %v1715_v1 = vld [vmem:[%s2202_s0] sm:$0xff]   ;;  %1709 = vmatprep.subr.msk.bf16.mxu0 %vm135_vm0, %v62_v0  ;;  %v137_v2 = vsel %vm135_vm0, %v62_v0, 0  ;;  %1710 = vmatprep.subr.msk.bf16.mxu1 %vm135_vm0, %v62_v0  ;;  %v1720_v6 = vld [vmem:[%s2202_s0 + $0x28] sm:$0xff]   ;;  %v1721_v7 = vld [vmem:[%s2202_s0 + $0x30] sm:$0xff]  }
   0x3   :  { %1478 = vmatpush3.bf16.msra.mxu0 %v137_v2  ;;  %1479 = vmatprep.mubr.msk.bf16.mxu0 %vm110_vm1, %v1715_v1  ;;  %v1719_v5 = vld [vmem:[%s2202_s0 + $0x20] sm:$0xff]   ;;  %v1718_v8 = vld [vmem:[%s2202_s0 + $0x18] sm:$0xff]  }
   0x4   :  { %1692 = vmatpush3.bf16.msra.mxu1 %v137_v2  ;;  %1487 = vmatprep.mubr.msk.bf16.mxu1 %vm110_vm1, %v1719_v5  ;;  %v1723_v9 = vld [vmem:[%s2207_s5] sm:$0xff]   ;;  %v1722_v10 = vld [vmem:[%s2202_s0 + $0x38] sm:$0xff]  }
   0x5   :  { %1513 = vmatprep.subr.bf16.mxu0 %v1723_v9 }
   0x6   :  { %1480 = vmatmul.mubr.msk.bf16.vlgmr.msra.gmra.mrb[0].mxu0 %vm110_vm1, %v1716_v3 }
   0x7   :  { %1483 = vmatprep.mubr.msk.bf16.mxu0 %vm110_vm1, %v1717_v4  ;;  %1488 = vmatmul.mubr.msk.bf16.vlgmr.msra.gmra.mrb[0].mxu1 %vm110_vm1, %v1720_v6 }
   0x8   :  { %1491 = vmatprep.mubr.msk.bf16.mxu1 %vm110_vm1, %v1721_v7  ;;  %1514 = vmatpush3.bf16.msra.mxu0 %v1723_v9 }
   0xe   :  { %1484 = vmatmul.mubr.msk.bf16.gmra.mrb[4].mxu0 %vm110_vm1, %v1718_v8 }
   0xf   :  { %1492 = vmatmul.mubr.msk.bf16.gmra.mrb[4].mxu1 %vm110_vm1, %v1722_v10 }
  0x10   :  { %1497 = vmatprep.mubr.msk.bf16.mxu1 %vm110_vm1, %v1715_v1 }
  0x11   :  { %18 = vsyncpa [#allocation3], 0  ;;  %v1724_v11 = vld [vmem:[%s2207_s5 + $0x8] sm:$0xff]   ;;  %v252_v12 = vld [vmem:[%s2205_s3] sm:$0xf]  ;;  %vm407_vm2 = vcmask 261120  }
  0x12   :  { %1515 = vmatprep.subr.bf16.mxu0 %v1724_v11  ;;  %v1725_v13 = vld [vmem:[%s2209_s7] sm:$0xff]   ;;  %1711 = vmatprep.subr.msk.bf16.mxu1 %vm135_vm0, %v252_v12  ;;  %v261_v14 = vsel %vm135_vm0, %v252_v12, 0  ;;  %v1726_v15 = vld [vmem:[%s2209_s7 + $0x8] sm:$0xff]   ;;  %v1727_v16 = vld [vmem:[%s2209_s7 + $0x10] sm:$0xff]   ;;  %vm765_vm3 = vcmask 130048  }
  0x13   :  { %1516 = vmatpush3.bf16.msra.mxu0 %v1724_v11  ;;  %1496 = vmatpush3.bf16.msra.mxu1 %v261_v14  ;;  %v1728_v17 = vld [vmem:[%s2209_s7 + $0x18] sm:$0xff]   ;;  %v1729_v18 = vld [vmem:[%s2209_s7 + $0x20] sm:$0xff]   ;;  %v1730_v19 = vld [vmem:[%s2209_s7 + $0x28] sm:$0xff]  }
  0x14   :  { %1533 = vmatprep.subr.bf16.mxu1 %v1725_v13  ;;  %v1316_v20 = vld [vmem:[%s2204_s2] ss:$0 sm:$0xff]  ;;  %v1732_v14 = vld [vmem:[%s2209_s7 + $0x38] sm:$0xff]  }
  0x17   :  { %1498 = vmatmul.mubr.msk.bf16.vlgmr.msra.gmra.mrb[8].mxu1 %vm110_vm1, %v1716_v3 }
  0x18   :  { %1534 = vmatpush3.bf16.msra.mxu1 %v1725_v13  ;;  %1501 = vmatprep.mubr.msk.bf16.mxu1 %vm110_vm1, %v1717_v4  ;;  %v1731_v13 = vld [vmem:[%s2209_s7 + $0x30] sm:$0xff]  }
  0x19   :  { %1535 = vmatprep.subr.bf16.mxu1 %v1726_v15 }
  0x1c   :  { %1536 = vmatpush3.bf16.msra.mxu1 %v1726_v15  ;;  %v1059_v15 = vld [vmem:[%s2214_s12] sm:$0xff] }
  0x1d   :  { %1537 = vmatprep.subr.bf16.mxu1 %v1727_v16 }
  0x1f   :  { %1502 = vmatmul.mubr.msk.bf16.gmra.mrb[12].mxu1 %vm110_vm1, %v1718_v8 }
  0x20   :  { %1538 = vmatpush3.bf16.msra.mxu1 %v1727_v16  ;;  %1505 = vmatprep.mubr.msk.bf16.mxu1 %vm110_vm1, %v1719_v5  ;;  %v1060_v16 = vld [vmem:[%s2214_s12 + $0x8] sm:$0xff] }
  0x21   :  { %1539 = vmatprep.subr.bf16.mxu1 %v1728_v17 }
  0x24   :  { %1540 = vmatpush3.bf16.msra.mxu1 %v1728_v17  ;;  %v1963_v17 = vpack.c.bf16 %v1060_v16, %v1059_v15 }
  0x25   :  { %1541 = vmatprep.subr.bf16.mxu1 %v1729_v18 }
  0x27   :  { %1506 = vmatmul.mubr.msk.bf16.gmra.mrb[16].mxu1 %vm110_vm1, %v1720_v6 }
  0x28   :  { %1542 = vmatpush3.bf16.msra.mxu1 %v1729_v18  ;;  %1509 = vmatprep.mubr.msk.bf16.mxu1 %vm110_vm1, %v1721_v7  ;;  %v1733_v18 = vld [vmem:[%s2212_s10] sm:$0xff]  }
  0x29   :  { %1543 = vmatprep.subr.bf16.mxu1 %v1730_v19  ;;  %1565 = vmatprep.subr.bf16.mxu0 %v1733_v18 }
  0x2c   :  { %1544 = vmatpush3.bf16.msra.mxu1 %v1730_v19 }
  0x2d   :  { %1545 = vmatprep.subr.bf16.mxu1 %v1731_v13 }
  0x2f   :  { %1510 = vmatmul.mubr.msk.bf16.gmra.mrb[20].mxu1 %vm110_vm1, %v1722_v10 }
  0x30   :  { %1546 = vmatpush3.bf16.msra.mxu1 %v1731_v13 }
  0x31   :  { %1547 = vmatprep.subr.bf16.mxu1 %v1732_v14 }
  0x34   :  { %1548 = vmatpush3.bf16.msra.mxu1 %v1732_v14  ;;  %v1989_v14 = vld [vmem:[%s2208_s6] ss:$0 sm:$0xff] }
  0x35   :  { %1660 = vmatprep.subr.bf16.mxu1 %v1963_v17 }
  0xd9   :  { %v1481_v21 = vpop.f32.mrb[0].mxu0 }
  0xda   :  { %v182_v22 = vadd.f32 %v1481_v21, %v1316_v20  ;;  %v173_v23 = vpop.f32.mrb[1].mxu0  ;;  %v1489_v28 = vpop.f32.mrb[0].mxu1  ;;  %v1734_v21 = vld [vmem:[%s2211_s9] sm:$0xff]  }
  0xdb   :  { %v174_v24 = vadd.f32 %v1316_v20, %v173_v23  ;;  %v1482_v25 = vpop.f32.mrb[2].mxu0  ;;  %v214_v30 = vadd.f32 %v1489_v28, %v1316_v20  ;;  %v205_v31 = vpop.f32.mrb[1].mxu1 }
  0xdc   :  { %v185_v26 = vadd.f32 %v1482_v25, %v1316_v20  ;;  %v176_v27 = vpop.f32.mrb[3].mxu0  ;;  %v238_v32 = vmax.f32 %v182_v22, 0.0  ;;  %v206_v34 = vadd.f32 %v1316_v20, %v205_v31  ;;  %v1490_v35 = vpop.f32.mrb[2].mxu1 }
  0xdd   :  { %v177_v29 = vadd.f32 %v1316_v20, %v176_v27  ;;  %v236_v36 = vmax.f32 %v174_v24, 0.0  ;;  %v246_v38 = vmax.f32 %v214_v30, 0.0  ;;  %v217_v39 = vadd.f32 %v1490_v35, %v1316_v20  ;;  %v208_v40 = vpop.f32.mrb[3].mxu1 }
  0xde   :  { %v239_v33 = vmax.f32 %v185_v26, 0.0  ;;  %v244_v42 = vmax.f32 %v206_v34, 0.0  ;;  %v209_v43 = vadd.f32 %v1316_v20, %v208_v40 }
  0xdf   :  { %v237_v37 = vmax.f32 %v177_v29, 0.0  ;;  %v247_v46 = vmax.f32 %v217_v39, 0.0 }
  0xe0   :  { %v377_v41 = vpack.c.bf16 %v239_v33, %v238_v32  ;;  %v245_v49 = vmax.f32 %v209_v43, 0.0 }
  0xe1   :  { %v376_v44 = vpack.c.bf16 %v237_v37, %v236_v36  ;;  %v1485_v45 = vpop.f32.mrb[4].mxu0  ;;  %v381_v52 = vpack.c.bf16 %v247_v46, %v246_v38 }
  0xe2   :  { %v198_v47 = vadd.f32 %v1485_v45, %v1316_v20  ;;  %v189_v48 = vpop.f32.mrb[5].mxu0  ;;  %v380_v55 = vpack.c.bf16 %v245_v49, %v244_v42  ;;  %v1493_v56 = vpop.f32.mrb[4].mxu1  ;;  %v1735_v49 = vld [vmem:[%s2211_s9 + $0x8] sm:$0xff]  }
  0xe3   :  { %v190_v50 = vadd.f32 %v1316_v20, %v189_v48  ;;  %v1486_v51 = vpop.f32.mrb[6].mxu0  ;;  %1517 = vmatprep.mubr.msk.bf16.mxu0 %vm407_vm2, %v376_v44  ;;  %v230_v58 = vadd.f32 %v1493_v56, %v1316_v20  ;;  %v221_v59 = vpop.f32.mrb[5].mxu1 }
  0xe4   :  { %v201_v53 = vadd.f32 %v1486_v51, %v1316_v20  ;;  %v192_v54 = vpop.f32.mrb[7].mxu0  ;;  %1518 = vmatmul.mubr.msk.bf16.vlgmr.msra.gmra.mrb[8].mxu0 %vm407_vm2, %v377_v41  ;;  %v242_v60 = vmax.f32 %v198_v47, 0.0  ;;  %v222_v62 = vadd.f32 %v1316_v20, %v221_v59  ;;  %v1494_v63 = vpop.f32.mrb[6].mxu1 }
  0xe5   :  { %v193_v57 = vadd.f32 %v1316_v20, %v192_v54  ;;  %v240_v0 = vmax.f32 %v190_v50, 0.0  ;;  %v250_v2 = vmax.f32 %v230_v58, 0.0  ;;  %v233_v3 = vadd.f32 %v1494_v63, %v1316_v20  ;;  %v224_v4 = vpop.f32.mrb[7].mxu1  ;;  %1566 = vmatpush3.bf16.msra.mxu0 %v1733_v18 }
  0xe6   :  { %v243_v61 = vmax.f32 %v201_v53, 0.0  ;;  %v248_v6 = vmax.f32 %v222_v62, 0.0  ;;  %v225_v7 = vadd.f32 %v1316_v20, %v224_v4  ;;  %v1333_v20 = vld [vmem:[%s2206_s4] ss:$0 sm:$0xff]  ;;  %1583 = vmatprep.subr.bf16.mxu0 %v1734_v21 }
  0xe7   :  { %v241_v1 = vmax.f32 %v193_v57, 0.0  ;;  %v251_v9 = vmax.f32 %v233_v3, 0.0 }
  0xe8   :  { %v379_v5 = vpack.c.bf16 %v243_v61, %v242_v60  ;;  %v249_v10 = vmax.f32 %v225_v7, 0.0 }
  0xe9   :  { %v378_v8 = vpack.c.bf16 %v241_v1, %v240_v0  ;;  %v383_v11 = vpack.c.bf16 %v251_v9, %v250_v2 }
  0xea   :  { %v382_v12 = vpack.c.bf16 %v249_v10, %v248_v6  ;;  %v1499_v19 = vpop.f32.mrb[8].mxu1 }
  0xeb   :  { %1521 = vmatprep.mubr.msk.bf16.mxu0 %vm407_vm2, %v378_v8  ;;  %v306_v22 = vadd.f32 %v1499_v19, %v1333_v20  ;;  %v297_v23 = vpop.f32.mrb[9].mxu1 }
  0xec   :  { %1522 = vmatmul.mubr.msk.bf16.gmra.mrb[12].mxu0 %vm407_vm2, %v379_v5  ;;  %v298_v24 = vadd.f32 %v1333_v20, %v297_v23  ;;  %v1500_v25 = vpop.f32.mrb[10].mxu1 }
  0xed   :  { %1525 = vmatprep.mubr.msk.bf16.mxu0 %vm407_vm2, %v380_v55  ;;  %v362_v26 = vmax.f32 %v306_v22, 0.0  ;;  %v309_v27 = vadd.f32 %v1500_v25, %v1333_v20  ;;  %v300_v28 = vpop.f32.mrb[11].mxu1 }
  0xee   :  { %v360_v29 = vmax.f32 %v298_v24, 0.0  ;;  %v301_v30 = vadd.f32 %v1333_v20, %v300_v28  ;;  %v1062_v28 = vld [vmem:[%s2214_s12 + $0x18] sm:$0xff] }
  0xef   :  { %v363_v32 = vmax.f32 %v309_v27, 0.0  ;;  %v1061_v27 = vld [vmem:[%s2214_s12 + $0x10] sm:$0xff] }
  0xf0   :  { %v361_v35 = vmax.f32 %v301_v30, 0.0 }
  0xf1   :  { %v750_v38 = vpack.c.bf16 %v363_v32, %v362_v26 }
  0xf2   :  { %v1503_v31 = vpop.f32.mrb[12].mxu1  ;;  %v749_v42 = vpack.c.bf16 %v361_v35, %v360_v29 }
  0xf3   :  { %v322_v33 = vadd.f32 %v1503_v31, %v1333_v20  ;;  %v313_v34 = vpop.f32.mrb[13].mxu1 }
  0xf4   :  { %1526 = vmatmul.mubr.msk.bf16.gmra.mrb[16].mxu0 %vm407_vm2, %v381_v52  ;;  %v314_v36 = vadd.f32 %v1333_v20, %v313_v34  ;;  %v1504_v37 = vpop.f32.mrb[14].mxu1  ;;  %v1663_v34 = vpack.c.bf16 %v1062_v28, %v1061_v27  ;;  %v1073_v27 = vld [vmem:[%s2214_s12 + $0x70] sm:$0xff]  ;;  %v1074_v28 = vld [vmem:[%s2214_s12 + $0x78] sm:$0xff] }
  0xf5   :  { %1529 = vmatprep.mubr.msk.bf16.mxu0 %vm407_vm2, %v382_v12  ;;  %v366_v39 = vmax.f32 %v322_v33, 0.0  ;;  %v325_v40 = vadd.f32 %v1504_v37, %v1333_v20  ;;  %v316_v41 = vpop.f32.mrb[15].mxu1  ;;  %v1063_v37 = vld [vmem:[%s2214_s12 + $0x20] sm:$0xff] }
  0xf6   :  { %v364_v43 = vmax.f32 %v314_v36, 0.0  ;;  %v317_v44 = vadd.f32 %v1333_v20, %v316_v41 }
  0xf7   :  { %v367_v46 = vmax.f32 %v325_v40, 0.0 }
  0xf8   :  { %v365_v50 = vmax.f32 %v317_v44, 0.0 }
  0xf9   :  { %v752_v53 = vpack.c.bf16 %v367_v46, %v366_v39 }
  0xfa   :  { %v1507_v45 = vpop.f32.mrb[16].mxu1  ;;  %v751_v57 = vpack.c.bf16 %v365_v50, %v364_v43 }
  0xfb   :  { %v338_v47 = vadd.f32 %v1507_v45, %v1333_v20  ;;  %v329_v48 = vpop.f32.mrb[17].mxu1 }
  0xfc   :  { %1530 = vmatmul.mubr.msk.bf16.gmra.mrb[20].mxu0 %vm407_vm2, %v383_v11  ;;  %v330_v51 = vadd.f32 %v1333_v20, %v329_v48  ;;  %v1508_v52 = vpop.f32.mrb[18].mxu1  ;;  %v1066_v48 = vld [vmem:[%s2214_s12 + $0x38] sm:$0xff] }
  0xfd   :  { %1567 = vmatprep.mubr.msk.bf16.mxu0 %vm765_vm3, %v749_v42  ;;  %v370_v54 = vmax.f32 %v338_v47, 0.0  ;;  %v341_v55 = vadd.f32 %v1508_v52, %v1333_v20  ;;  %v332_v56 = vpop.f32.mrb[19].mxu1  ;;  %v1065_v47 = vld [vmem:[%s2214_s12 + $0x30] sm:$0xff] }
  0xfe   :  { %v368_v58 = vmax.f32 %v330_v51, 0.0  ;;  %v333_v59 = vadd.f32 %v1333_v20, %v332_v56  ;;  %v1067_v56 = vld [vmem:[%s2214_s12 + $0x40] sm:$0xff] }
  0xff   :  { %v371_v61 = vmax.f32 %v341_v55, 0.0 }
 0x100   :  { %v369_v0 = vmax.f32 %v333_v59, 0.0 }
 0x101   :  { %v754_v3 = vpack.c.bf16 %v371_v61, %v370_v54 }
 0x102   :  { %v1511_v60 = vpop.f32.mrb[20].mxu1  ;;  %v753_v7 = vpack.c.bf16 %v369_v0, %v368_v58 }
 0x103   :  { %v354_v62 = vadd.f32 %v1511_v60, %v1333_v20  ;;  %v345_v63 = vpop.f32.mrb[21].mxu1 }
 0x104   :  { %1568 = vmatmul.mubr.msk.bf16.vlgmr.msra.gmra.mrb[24].mxu0 %vm765_vm3, %v750_v38  ;;  %v346_v1 = vadd.f32 %v1333_v20, %v345_v63  ;;  %v1512_v2 = vpop.f32.mrb[22].mxu1  ;;  %v1064_v38 = vld [vmem:[%s2214_s12 + $0x28] sm:$0xff] }
 0x105   :  { %1584 = vmatpush3.bf16.msra.mxu0 %v1734_v21  ;;  %1571 = vmatprep.mubr.msk.bf16.mxu0 %vm765_vm3, %v751_v57  ;;  %v374_v4 = vmax.f32 %v354_v62, 0.0  ;;  %v357_v5 = vadd.f32 %v1512_v2, %v1333_v20  ;;  %v348_v6 = vpop.f32.mrb[23].mxu1  ;;  %v1667_v44 = vpack.c.bf16 %v1064_v38, %v1063_v37  ;;  %v1068_v57 = vld [vmem:[%s2214_s12 + $0x48] sm:$0xff]  ;;  %v1069_v2 = vld [vmem:[%s2214_s12 + $0x50] sm:$0xff] }
 0x106   :  { %1585 = vmatprep.subr.bf16.mxu0 %v1735_v49  ;;  %v372_v8 = vmax.f32 %v346_v1, 0.0  ;;  %v349_v9 = vadd.f32 %v1333_v20, %v348_v6  ;;  %v1675_v63 = vpack.c.bf16 %v1068_v57, %v1067_v56 }
 0x107   :  { %v375_v10 = vmax.f32 %v357_v5, 0.0 }
 0x108   :  { %v373_v11 = vmax.f32 %v349_v9, 0.0 }
 0x109   :  { %1586 = vmatpush3.bf16.msra.mxu0 %v1735_v49  ;;  %v756_v12 = vpack.c.bf16 %v375_v10, %v374_v4 }
 0x10a   :  { %v755_v13 = vpack.c.bf16 %v373_v11, %v372_v8 }
 0x10c   :  { %1572 = vmatmul.mubr.msk.bf16.gmra.mrb[28].mxu0 %vm765_vm3, %v752_v53  ;;  %v1671_v53 = vpack.c.bf16 %v1066_v48, %v1065_v47 }
 0x10d   :  { %1575 = vmatprep.mubr.msk.bf16.mxu0 %vm765_vm3, %v753_v7 }
 0x114   :  { %1576 = vmatmul.mubr.msk.bf16.gmra.mrb[32].mxu0 %vm765_vm3, %v754_v3  ;;  %v1070_v3 = vld [vmem:[%s2214_s12 + $0x58] sm:$0xff] }
 0x115   :  { %1579 = vmatprep.mubr.msk.bf16.mxu0 %vm765_vm3, %v755_v13  ;;  %v1679_v9 = vpack.c.bf16 %v1070_v3, %v1069_v2  ;;  %v1072_v13 = vld [vmem:[%s2214_s12 + $0x68] sm:$0xff] }
 0x11c   :  { %1580 = vmatmul.mubr.msk.bf16.gmra.mrb[36].mxu0 %vm765_vm3, %v756_v12  ;;  %v1071_v12 = vld [vmem:[%s2214_s12 + $0x60] sm:$0xff] }
 0x1b7   :  { %v1519_v15 = vpop.f32.mrb[8].mxu0 }
 0x1b8   :  { %v466_v16 = vpop.f32.mrb[9].mxu0  ;;  %v475_v20 = vadd.f32 %v1519_v15, %v1989_v14 }
 0x1b9   :  { %v467_v18 = vadd.f32 %v1989_v14, %v466_v16  ;;  %v1520_v19 = vpop.f32.mrb[10].mxu0 }
 0x1ba   :  { %v478_v21 = vadd.f32 %v1520_v19, %v1989_v14  ;;  %v469_v22 = vpop.f32.mrb[11].mxu0  ;;  %v2007_v29 = vmax.f32 %v475_v20, 0.0 }
 0x1bb   :  { %v470_v23 = vadd.f32 %v1989_v14, %v469_v22  ;;  %v1997_v25 = vmax.f32 %v467_v18, 0.0 }
 0x1bc   :  { %v1995_v24 = vmax.f32 %v478_v21, 0.0  ;;  %v1683_v21 = vpack.c.bf16 %v1072_v13, %v1071_v12 }
 0x1bd   :  { %v1999_v26 = vmax.f32 %v470_v23, 0.0 }
 0x1be   :  { %v546_v32 = vpack.c.bf16 %v1995_v24, %v2007_v29 }
 0x1bf   :  { %v1523_v30 = vpop.f32.mrb[12].mxu0  ;;  %v545_v31 = vpack.c.bf16 %v1999_v26, %v1997_v25 }
 0x1c0   :  { %v482_v33 = vpop.f32.mrb[13].mxu0  ;;  %v491_v39 = vadd.f32 %v1523_v30, %v1989_v14 }
 0x1c1   :  { %v483_v35 = vadd.f32 %v1989_v14, %v482_v33  ;;  %v1524_v36 = vpop.f32.mrb[14].mxu0  ;;  %1549 = vmatprep.mubr.bf16.mxu1 %v545_v31  ;;  %v1043_v33 = vmul.f32 %v1997_v25, %v1997_v25 }
 0x1c2   :  { %v494_v40 = vadd.f32 %v1524_v36, %v1989_v14  ;;  %v485_v41 = vpop.f32.mrb[15].mxu0  ;;  %1550 = vmatmul.mubr.bf16.vlgmr.msra.gmra.mrb[24].mxu1 %v546_v32  ;;  %v2036_v49 = vmax.f32 %v491_v39, 0.0  ;;  %v1687_v32 = vpack.c.bf16 %v1074_v28, %v1073_v27  ;;  %v1046_v36 = vmul.f32 %v1995_v24, %v1995_v24 }
 0x1c3   :  { %v486_v42 = vadd.f32 %v1989_v14, %v485_v41  ;;  %1662 = vmatpush3.bf16.msra.mxu1 %v1963_v17  ;;  %v2026_v45 = vmax.f32 %v483_v35, 0.0  ;;  %v1045_v35 = vmul.f32 %v2007_v29, %v2007_v29 }
 0x1c4   :  { %v2024_v43 = vmax.f32 %v494_v40, 0.0  ;;  %1664 = vmatprep.subr.bf16.mxu1 %v1663_v34  ;;  %v1049_v39 = vmul.f32 %v2036_v49, %v2036_v49 }
 0x1c5   :  { %v2028_v46 = vmax.f32 %v486_v42, 0.0  ;;  %v1047_v37 = vmul.f32 %v2026_v45, %v2026_v45 }
 0x1c6   :  { %v548_v52 = vpack.c.bf16 %v2024_v43, %v2036_v49  ;;  %v1050_v40 = vmul.f32 %v2024_v43, %v2024_v43 }
 0x1c7   :  { %v1527_v50 = vpop.f32.mrb[16].mxu0  ;;  %1666 = vmatpush3.bf16.msra.mxu1 %v1663_v34  ;;  %v547_v17 = vpack.c.bf16 %v2028_v46, %v2026_v45  ;;  %v1044_v34 = vmul.f32 %v1999_v26, %v1999_v26  ;;  %v1048_v38 = vmul.f32 %v2028_v46, %v2028_v46 }
 0x1c8   :  { %v498_v51 = vpop.f32.mrb[17].mxu0  ;;  %1668 = vmatprep.subr.bf16.mxu1 %v1667_v44  ;;  %v507_v58 = vadd.f32 %v1527_v50, %v1989_v14 }
 0x1c9   :  { %v499_v54 = vadd.f32 %v1989_v14, %v498_v51  ;;  %v1528_v55 = vpop.f32.mrb[18].mxu0  ;;  %1553 = vmatprep.mubr.bf16.mxu1 %v547_v17 }
 0x1ca   :  { %v510_v59 = vadd.f32 %v1528_v55, %v1989_v14  ;;  %v501_v60 = vpop.f32.mrb[19].mxu0  ;;  %1554 = vmatmul.mubr.bf16.gmra.mrb[28].mxu1 %v548_v52  ;;  %v2064_v4 = vmax.f32 %v507_v58, 0.0  ;;  %v1353_v52 = vld [vmem:[%s2210_s8] ss:$0 sm:$0xff] }
 0x1cb   :  { %v502_v61 = vadd.f32 %v1989_v14, %v501_v60  ;;  %1670 = vmatpush3.bf16.msra.mxu1 %v1667_v44  ;;  %v2054_v0 = vmax.f32 %v499_v54, 0.0 }
 0x1cc   :  { %v2052_v62 = vmax.f32 %v510_v59, 0.0  ;;  %1672 = vmatprep.subr.bf16.mxu1 %v1671_v53  ;;  %v1053_v44 = vmul.f32 %v2064_v4, %v2064_v4 }
 0x1cd   :  { %v2056_v1 = vmax.f32 %v502_v61, 0.0  ;;  %v1051_v41 = vmul.f32 %v2054_v0, %v2054_v0 }
 0x1ce   :  { %v550_v8 = vpack.c.bf16 %v2052_v62, %v2064_v4  ;;  %v1054_v47 = vmul.f32 %v2052_v62, %v2052_v62 }
 0x1cf   :  { %v1531_v5 = vpop.f32.mrb[20].mxu0  ;;  %1674 = vmatpush3.bf16.msra.mxu1 %v1671_v53  ;;  %v549_v6 = vpack.c.bf16 %v2056_v1, %v2054_v0  ;;  %v1052_v42 = vmul.f32 %v2056_v1, %v2056_v1 }
 0x1d0   :  { %v514_v7 = vpop.f32.mrb[21].mxu0  ;;  %1676 = vmatprep.subr.bf16.mxu1 %v1675_v63  ;;  %v523_v15 = vadd.f32 %v1531_v5, %v1989_v14 }
 0x1d1   :  { %v515_v10 = vadd.f32 %v1989_v14, %v514_v7  ;;  %v1532_v11 = vpop.f32.mrb[22].mxu0  ;;  %1557 = vmatprep.mubr.bf16.mxu1 %v549_v6 }
 0x1d2   :  { %v526_v16 = vadd.f32 %v1532_v11, %v1989_v14  ;;  %v517_v18 = vpop.f32.mrb[23].mxu0  ;;  %1558 = vmatmul.mubr.bf16.gmra.mrb[32].mxu1 %v550_v8  ;;  %v2092_v30 = vmax.f32 %v523_v15, 0.0 }
 0x1d3   :  { %v518_v19 = vadd.f32 %v1989_v14, %v517_v18  ;;  %1678 = vmatpush3.bf16.msra.mxu1 %v1675_v63  ;;  %v2082_v22 = vmax.f32 %v515_v10, 0.0 }
 0x1d4   :  { %v2080_v20 = vmax.f32 %v526_v16, 0.0  ;;  %1680 = vmatprep.subr.bf16.mxu1 %v1679_v9  ;;  %v1057_v17 = vmul.f32 %v2092_v30, %v2092_v30 }
 0x1d5   :  { %v2084_v23 = vmax.f32 %v518_v19, 0.0  ;;  %v1055_v48 = vmul.f32 %v2082_v22, %v2082_v22 }
 0x1d6   :  { %v552_v31 = vpack.c.bf16 %v2080_v20, %v2092_v30  ;;  %v1058_v51 = vmul.f32 %v2080_v20, %v2080_v20 }
 0x1d7   :  { %1682 = vmatpush3.bf16.msra.mxu1 %v1679_v9  ;;  %v551_v14 = vpack.c.bf16 %v2084_v23, %v2082_v22  ;;  %v1056_v50 = vmul.f32 %v2084_v23, %v2084_v23 }
 0x1d8   :  { %1684 = vmatprep.subr.bf16.mxu1 %v1683_v21 }
 0x1d9   :  { %1561 = vmatprep.mubr.bf16.mxu1 %v551_v14 }
 0x1da   :  { %1562 = vmatmul.mubr.bf16.gmra.mrb[36].mxu1 %v552_v31 }
 0x1db   :  { %1686 = vmatpush3.bf16.msra.mxu1 %v1683_v21  ;;  %1635 = vmatprep.mubr.f32.mxu1 %v1043_v33 }
 0x1dc   :  { %1688 = vmatprep.subr.bf16.mxu1 %v1687_v32 }
 0x1df   :  { %1690 = vmatpush3.bf16.msra.mxu1 %v1687_v32 }
 0x1e2   :  { %1636 = vmatmul.mubr.f32.vlgmr.msra.gmra.mrb[40].mxu1 %v1044_v34 }
 0x1e3   :  { %1638 = vmatprep.mubr.f32.mxu1 %v1045_v35 }
 0x1e6   :  { %1639 = vmatmul.mubr.f32.gmra.mrb[42].mxu1 %v1046_v36 }
 0x1e7   :  { %1641 = vmatprep.mubr.f32.mxu1 %v1047_v37 }
 0x1ea   :  { %1642 = vmatmul.mubr.f32.gmra.mrb[44].mxu1 %v1048_v38 }
 0x1eb   :  { %1644 = vmatprep.mubr.f32.mxu1 %v1049_v39 }
 0x1ee   :  { %1645 = vmatmul.mubr.f32.gmra.mrb[46].mxu1 %v1050_v40 }
 0x1ef   :  { %1647 = vmatprep.mubr.f32.mxu1 %v1051_v41 }
 0x1f2   :  { %1648 = vmatmul.mubr.f32.gmra.mrb[48].mxu1 %v1052_v42 }
 0x1f3   :  { %1650 = vmatprep.mubr.f32.mxu1 %v1053_v44 }
 0x1f6   :  { %1651 = vmatmul.mubr.f32.gmra.mrb[50].mxu1 %v1054_v47 }
 0x1f7   :  { %1653 = vmatprep.mubr.f32.mxu1 %v1055_v48 }
 0x1fa   :  { %1654 = vmatmul.mubr.f32.gmra.mrb[52].mxu1 %v1056_v50 }
 0x1fb   :  { %1656 = vmatprep.mubr.f32.mxu1 %v1057_v17 }
 0x1fe   :  { %1657 = vmatmul.mubr.f32.gmra.mrb[54].mxu1 %v1058_v51 }
 0x295   :  { %v1551_v53 = vpop.f32.mrb[24].mxu1 }
 0x296   :  { %v667_v54 = vadd.f32 %v1551_v53, %v1353_v52  ;;  %v658_v55 = vpop.f32.mrb[25].mxu1 }
 0x297   :  { %v659_v56 = vadd.f32 %v1353_v52, %v658_v55  ;;  %v1552_v57 = vpop.f32.mrb[26].mxu1 }
 0x298   :  { %v670_v58 = vadd.f32 %v1552_v57, %v1353_v52  ;;  %v661_v59 = vpop.f32.mrb[27].mxu1  ;;  %v723_v61 = vmax.f32 %v667_v54, 0.0 }
 0x299   :  { %v662_v60 = vadd.f32 %v1353_v52, %v661_v59  ;;  %v721_v2 = vmax.f32 %v659_v56, 0.0 }
 0x29a   :  { %v724_v63 = vmax.f32 %v670_v58, 0.0 }
 0x29b   :  { %v722_v3 = vmax.f32 %v662_v60, 0.0 }
 0x29c   :  { %v738_v5 = vpack.c.bf16 %v724_v63, %v723_v61 }
 0x29d   :  { %v737_v6 = vpack.c.bf16 %v722_v3, %v721_v2  ;;  %v1555_v7 = vpop.f32.mrb[28].mxu1 }
 0x29e   :  { %v683_v8 = vadd.f32 %v1555_v7, %v1353_v52  ;;  %v674_v9 = vpop.f32.mrb[29].mxu1 }
 0x29f   :  { %v675_v10 = vadd.f32 %v1353_v52, %v674_v9  ;;  %v1556_v11 = vpop.f32.mrb[30].mxu1  ;;  %1587 = vmatprep.mubr.msk.bf16.mxu0 %vm407_vm2, %v737_v6 }
 0x2a0   :  { %v686_v12 = vadd.f32 %v1556_v11, %v1353_v52  ;;  %v677_v13 = vpop.f32.mrb[31].mxu1  ;;  %1588 = vmatmul.mubr.msk.bf16.vlgmr.msra.gmra.mrb[24].mxu0 %vm407_vm2, %v738_v5  ;;  %v727_v16 = vmax.f32 %v683_v8, 0.0 }
 0x2a1   :  { %v678_v15 = vadd.f32 %v1353_v52, %v677_v13  ;;  %v725_v19 = vmax.f32 %v675_v10, 0.0 }
 0x2a2   :  { %v728_v18 = vmax.f32 %v686_v12, 0.0 }
 0x2a3   :  { %v726_v21 = vmax.f32 %v678_v15, 0.0 }
 0x2a4   :  { %v740_v27 = vpack.c.bf16 %v728_v18, %v727_v16 }
 0x2a5   :  { %v739_v28 = vpack.c.bf16 %v726_v21, %v725_v19  ;;  %v1559_v14 = vpop.f32.mrb[32].mxu1 }
 0x2a6   :  { %v699_v31 = vadd.f32 %v1559_v14, %v1353_v52  ;;  %v690_v32 = vpop.f32.mrb[33].mxu1 }
 0x2a7   :  { %v691_v33 = vadd.f32 %v1353_v52, %v690_v32  ;;  %v1560_v34 = vpop.f32.mrb[34].mxu1  ;;  %1591 = vmatprep.mubr.msk.bf16.mxu0 %vm407_vm2, %v739_v28 }
 0x2a8   :  { %v702_v35 = vadd.f32 %v1560_v34, %v1353_v52  ;;  %v693_v36 = vpop.f32.mrb[35].mxu1  ;;  %1592 = vmatmul.mubr.msk.bf16.gmra.mrb[28].mxu0 %vm407_vm2, %v740_v27  ;;  %v731_v38 = vmax.f32 %v699_v31, 0.0 }
 0x2a9   :  { %v694_v37 = vadd.f32 %v1353_v52, %v693_v36  ;;  %v729_v40 = vmax.f32 %v691_v33, 0.0 }
 0x2aa   :  { %v732_v39 = vmax.f32 %v702_v35, 0.0  ;;  %v2152_v35 = vld [vmem:[%s2213_s11] ss:$0 sm:$0xff]  ;;  %s1792_s11 = smov [#allocation2]  }
 0x2ab   :  { %v730_v41 = vmax.f32 %v694_v37, 0.0  ;;  %s1305_s18 = sshll.u32 %s1792_s11, 4  ;;  %s1306_s18 = int_to_ptr.vmem [resolvable:$true] %s1305_s18 }
 0x2ac   :  { %v742_v42 = vpack.c.bf16 %v732_v39, %v731_v38  ;;  %s1768_s19 = scalar_lea.vmem %s1306_s18, 2048  ;;  %p1773_p1 = scmp.lt.s32.totalorder %s1306_s18, %s1306_s18 }
 0x2ad   :  { %v741_v44 = vpack.c.bf16 %v730_v41, %v729_v40  ;;  %v1563_v47 = vpop.f32.mrb[36].mxu1  ;;  %p1769_p0 = scmp.ne.s32.totalorder %s1306_s18, %s1768_s19  ;;  %p1774_p2 = scmp.lt.s32.totalorder %s1768_s19, %s1768_s19 }
 0x2ae   :  { %v715_v48 = vadd.f32 %v1563_v47, %v1353_v52  ;;  %v706_v50 = vpop.f32.mrb[37].mxu1 }
 0x2af   :  { %v707_v17 = vadd.f32 %v1353_v52, %v706_v50  ;;  %v1564_v51 = vpop.f32.mrb[38].mxu1  ;;  %1595 = vmatprep.mubr.msk.bf16.mxu0 %vm407_vm2, %v741_v44  ;;  %p1775_p3 = por %p1774_p2, %p1773_p1 }
 0x2b0   :  { %v718_v53 = vadd.f32 %v1564_v51, %v1353_v52  ;;  %v709_v54 = vpop.f32.mrb[39].mxu1  ;;  %1596 = vmatmul.mubr.msk.bf16.gmra.mrb[32].mxu0 %vm407_vm2, %v742_v42  ;;  %v735_v56 = vmax.f32 %v715_v48, 0.0 }
 0x2b1   :  { %v710_v55 = vadd.f32 %v1353_v52, %v709_v54  ;;  %v733_v58 = vmax.f32 %v707_v17, 0.0  ;;  %p1776_p4 = pnand %p1775_p3, %p1769_p0 }
 0x2b2   :  { %v736_v57 = vmax.f32 %v718_v53, 0.0 }
 0x2b3   :  { %v734_v59 = vmax.f32 %v710_v55, 0.0 }
 0x2b4   :  { %v744_v60 = vpack.c.bf16 %v736_v57, %v735_v56 }
 0x2b5   :  { %v743_v61 = vpack.c.bf16 %v734_v59, %v733_v58  ;;  %v1637_v63 = vpop.f32.mrb[40].mxu1 }
 0x2b6   :  { %v1141_v2 = vpop.f32.mrb[41].mxu1  ;;  %v1221_v28 = vmax.f32 %v1637_v63, 1e-24 }
 0x2b7   :  { %1599 = vmatprep.mubr.msk.bf16.mxu0 %vm407_vm2, %v743_v61  ;;  %v1220_v21 = vmax.f32 %v1141_v2, 1e-24 }
 0x2b8   :  { %1600 = vmatmul.mubr.msk.bf16.gmra.mrb[36].mxu0 %vm407_vm2, %v744_v60 }
 0x2b9   :  { %v1640_v3 = vpop.f32.mrb[42].mxu1 }
 0x2ba   :  { %v1151_v5 = vpop.f32.mrb[43].mxu1  ;;  %v1223_v27 = vmax.f32 %v1640_v3, 1e-24 }
 0x2bb   :  { %v1222_v19 = vmax.f32 %v1151_v5, 1e-24 }
 0x2bd   :  { %v1643_v6 = vpop.f32.mrb[44].mxu1  ;;  %1736 = vrsqrt.f32 %v1222_v19 }
 0x2be   :  { %v1161_v7 = vpop.f32.mrb[45].mxu1  ;;  %1738 = vrsqrt.f32 %v1220_v21  ;;  %v1225_v33 = vmax.f32 %v1643_v6, 1e-24 }
 0x2bf   :  { %1740 = vrsqrt.f32 %v1223_v27  ;;  %v1224_v31 = vmax.f32 %v1161_v7, 1e-24 }
 0x2c0   :  { %1742 = vrsqrt.f32 %v1221_v28 }
 0x2c1   :  { %v1646_v8 = vpop.f32.mrb[46].mxu1 }
 0x2c2   :  { %v1171_v9 = vpop.f32.mrb[47].mxu1  ;;  %v1227_v32 = vmax.f32 %v1646_v8, 1e-24 }
 0x2c3   :  { %v1226_v14 = vmax.f32 %v1171_v9, 1e-24 }
 0x2c5   :  { %v1649_v10 = vpop.f32.mrb[48].mxu1  ;;  %1744 = vrsqrt.f32 %v1226_v14 }
 0x2c6   :  { %v1181_v52 = vpop.f32.mrb[49].mxu1  ;;  %1746 = vrsqrt.f32 %v1224_v31  ;;  %v1229_v53 = vmax.f32 %v1649_v10, 1e-24 }
 0x2c7   :  { %v1737_v34 = vpop.eup %1736  ;;  %1748 = vrsqrt.f32 %v1227_v32  ;;  %v1228_v41 = vmax.f32 %v1181_v52, 1e-24 }
 0x2c8   :  { %v1739_v36 = vpop.eup %1738  ;;  %1750 = vrsqrt.f32 %v1225_v33  ;;  %v1254_v44 = vmul.f32 %v1737_v34, %v2007_v29 }
 0x2c9   :  { %v1652_v11 = vpop.f32.mrb[50].mxu1  ;;  %v1741_v37 = vpop.eup %1740  ;;  %v1252_v17 = vmul.f32 %v1739_v36, %v1997_v25 }
 0x2ca   :  { %v1191_v12 = vpop.f32.mrb[51].mxu1  ;;  %v1743_v40 = vpop.eup %1742  ;;  %v1231_v48 = vmax.f32 %v1652_v11, 1e-24  ;;  %v1255_v56 = vmul.f32 %v1741_v37, %v1995_v24 }
 0x2cb   :  { %v1230_v38 = vmax.f32 %v1191_v12, 1e-24  ;;  %v1253_v29 = vmul.f32 %v1743_v40, %v1999_v26 }
 0x2cd   :  { %v2141_v13 = vpop.f32.mrb[52].mxu1  ;;  %1752 = vrsqrt.f32 %v1230_v38 }
 0x2ce   :  { %v2143_v15 = vpop.f32.mrb[53].mxu1  ;;  %1754 = vrsqrt.f32 %v1228_v41  ;;  %v1233_v12 = vmax.f32 %v2141_v13, 1e-24 }
 0x2cf   :  { %v1745_v61 = vpop.eup %1744  ;;  %1756 = vrsqrt.f32 %v1231_v48  ;;  %v1232_v6 = vmax.f32 %v2143_v15, 1e-24 }
 0x2d0   :  { %v1747_v63 = vpop.eup %1746  ;;  %1758 = vrsqrt.f32 %v1229_v53  ;;  %v1258_v7 = vmul.f32 %v1745_v61, %v2036_v49 }
 0x2d1   :  { %v2145_v16 = vpop.f32.mrb[54].mxu1  ;;  %v1749_v2 = vpop.eup %1748  ;;  %v1256_v52 = vmul.f32 %v1747_v63, %v2026_v45 }
 0x2d2   :  { %v2147_v18 = vpop.f32.mrb[55].mxu1  ;;  %v1751_v5 = vpop.eup %1750  ;;  %v1235_v9 = vmax.f32 %v2145_v16, 1e-24  ;;  %v1259_v21 = vmul.f32 %v1749_v2, %v2024_v43 }
 0x2d3   :  { %v1234_v24 = vmax.f32 %v2147_v18, 1e-24  ;;  %v1257_v28 = vmul.f32 %v1751_v5, %v2028_v46 }
 0x2d5   :  { %1760 = vrsqrt.f32 %v1234_v24 }
 0x2d6   :  { %1762 = vrsqrt.f32 %v1232_v6 }
 0x2d7   :  { %v1753_v14 = vpop.eup %1752  ;;  %1764 = vrsqrt.f32 %v1235_v9 }
 0x2d8   :  { %v1755_v13 = vpop.eup %1754  ;;  %1766 = vrsqrt.f32 %v1233_v12  ;;  %v1262_v34 = vmul.f32 %v1753_v14, %v2064_v4 }
 0x2d9   :  { %v1757_v31 = vpop.eup %1756  ;;  %v1260_v37 = vmul.f32 %v1755_v13, %v2054_v0 }
 0x2da   :  { %v1759_v32 = vpop.eup %1758  ;;  %v1263_v41 = vmul.f32 %v1757_v31, %v2052_v62 }
 0x2db   :  { %v1261_v48 = vmul.f32 %v1759_v32, %v2056_v1 }
 0x2df   :  { %v1761_v4 = vpop.eup %1760 }
 0x2e0   :  { %v1266_v62 = vmul.f32 %v1761_v4, %v2092_v30 }
 0x373   :  { %v1589_v39 = vpop.f32.mrb[24].mxu0 }
 0x374   :  { %v1029_v42 = vadd.f32 %v1589_v39, %v2152_v35  ;;  %v957_v47 = vpop.f32.mrb[25].mxu0 }
 0x375   :  { %v1027_v50 = vadd.f32 %v2152_v35, %v957_v47  ;;  %v1590_v51 = vpop.f32.mrb[26].mxu0 }
 0x376   :  { %v1270_v54 = vadd.f32 %v1254_v44, %v1029_v42  ;;  %v1030_v55 = vadd.f32 %v1590_v51, %v2152_v35  ;;  %v960_v57 = vpop.f32.mrb[27].mxu0  ;;  %v1763_v51 = vpop.eup %1762 }
 0x377   :  { %v1268_v58 = vadd.f32 %v1252_v17, %v1027_v50  ;;  %v1028_v59 = vadd.f32 %v2152_v35, %v960_v57  ;;  %v1765_v0 = vpop.eup %1764  ;;  %v1264_v1 = vmul.f32 %v1763_v51, %v2082_v22 }
 0x378   :  { %1286 = vst [vmem:[#allocation2 + $0x10] sm:$0xff] %v1270_v54  ;;  %v1271_v60 = vadd.f32 %v1255_v56, %v1030_v55  ;;  %v1767_v54 = vpop.eup %1766 }
 0x379   :  { %1284 = vst [vmem:[#allocation2] sm:$0xff] %v1268_v58  ;;  %v1269_v25 = vadd.f32 %v1253_v29, %v1028_v59  ;;  %v1265_v2 = vmul.f32 %v1767_v54, %v2084_v23 }
 0x37a   :  { %1287 = vst [vmem:[#allocation2 + $0x18] sm:$0xff] %v1271_v60  ;;  %v1267_v60 = vmul.f32 %v1765_v0, %v2080_v20 }
 0x37b   :  { %1285 = vst [vmem:[#allocation2 + $0x8] sm:$0xff] %v1269_v25  ;;  %v1593_v3 = vpop.f32.mrb[28].mxu0 }
 0x37c   :  { %v1033_v26 = vadd.f32 %v1593_v3, %v2152_v35  ;;  %v973_v8 = vpop.f32.mrb[29].mxu0 }
 0x37d   :  { %v1031_v10 = vadd.f32 %v2152_v35, %v973_v8  ;;  %v1594_v11 = vpop.f32.mrb[30].mxu0 }
 0x37e   :  { %v1274_v18 = vadd.f32 %v1258_v7, %v1033_v26  ;;  %v1034_v19 = vadd.f32 %v1594_v11, %v2152_v35  ;;  %v976_v15 = vpop.f32.mrb[31].mxu0 }
 0x37f   :  { %v1272_v27 = vadd.f32 %v1256_v52, %v1031_v10  ;;  %v1032_v49 = vadd.f32 %v2152_v35, %v976_v15 }
 0x380   :  { %1290 = vst [vmem:[#allocation2 + $0x30] sm:$0xff] %v1274_v18  ;;  %v1275_v16 = vadd.f32 %v1259_v21, %v1034_v19 }
 0x381   :  { %1288 = vst [vmem:[#allocation2 + $0x20] sm:$0xff] %v1272_v27  ;;  %v1273_v45 = vadd.f32 %v1257_v28, %v1032_v49 }
 0x382   :  { %1291 = vst [vmem:[#allocation2 + $0x38] sm:$0xff] %v1275_v16 }
 0x383   :  { %1289 = vst [vmem:[#allocation2 + $0x28] sm:$0xff] %v1273_v45  ;;  %v1597_v43 = vpop.f32.mrb[32].mxu0 }
 0x384   :  { %v1037_v33 = vadd.f32 %v1597_v43, %v2152_v35  ;;  %v989_v36 = vpop.f32.mrb[33].mxu0 }
 0x385   :  { %v1035_v46 = vadd.f32 %v2152_v35, %v989_v36  ;;  %v1598_v38 = vpop.f32.mrb[34].mxu0 }
 0x386   :  { %v1278_v39 = vadd.f32 %v1262_v34, %v1037_v33  ;;  %v1038_v40 = vadd.f32 %v1598_v38, %v2152_v35  ;;  %v992_v42 = vpop.f32.mrb[35].mxu0 }
 0x387   :  { %v1276_v44 = vadd.f32 %v1260_v37, %v1035_v46  ;;  %v1036_v47 = vadd.f32 %v2152_v35, %v992_v42 }
 0x388   :  { %1294 = vst [vmem:[#allocation2 + $0x50] sm:$0xff] %v1278_v39  ;;  %v1279_v50 = vadd.f32 %v1263_v41, %v1038_v40 }
 0x389   :  { %1292 = vst [vmem:[#allocation2 + $0x40] sm:$0xff] %v1276_v44  ;;  %v1277_v17 = vadd.f32 %v1261_v48, %v1036_v47 }
 0x38a   :  { %1295 = vst [vmem:[#allocation2 + $0x58] sm:$0xff] %v1279_v50 }
 0x38b   :  { %1293 = vst [vmem:[#allocation2 + $0x48] sm:$0xff] %v1277_v17  ;;  %v1601_v53 = vpop.f32.mrb[36].mxu0 }
 0x38c   :  { %v1041_v55 = vadd.f32 %v1601_v53, %v2152_v35  ;;  %v1005_v56 = vpop.f32.mrb[37].mxu0 }
 0x38d   :  { %v1039_v57 = vadd.f32 %v2152_v35, %v1005_v56  ;;  %v1602_v58 = vpop.f32.mrb[38].mxu0 }
 0x38e   :  { %v1282_v59 = vadd.f32 %v1266_v62, %v1041_v55  ;;  %v1042_v29 = vadd.f32 %v1602_v58, %v2152_v35  ;;  %v1008_v61 = vpop.f32.mrb[39].mxu0 }
 0x38f   :  { %v1280_v25 = vadd.f32 %v1264_v1, %v1039_v57  ;;  %v1040_v63 = vadd.f32 %v2152_v35, %v1008_v61 }
 0x390   :  { %1298 = vst [vmem:[#allocation2 + $0x70] sm:$0xff] %v1282_v59  ;;  %v1283_v30 = vadd.f32 %v1267_v60, %v1042_v29 }
 0x391   :  { %1296 = vst [vmem:[#allocation2 + $0x60] sm:$0xff] %v1280_v25  ;;  %v1281_v24 = vadd.f32 %v1265_v2, %v1040_v63 }
 0x392   :  { %1299 = vst [vmem:[#allocation2 + $0x78] sm:$0xff] %v1283_v30 }
 0x393   :  { %1297 = vst [vmem:[#allocation2 + $0x68] sm:$0xff] %v1281_v24 }
 0x394   :  { %1779 = shalt.err (!%p1776_p4)
}
 0x395   :  { %s1780_s22 = scalar_lea.hbm %s2215_s13, 2048 }
 0x396   :  { %p1781_p5 = scmp.ne.s32.totalorder %s2215_s13, %s1780_s22  ;;  %p1784_p6 = scmp.lt.u32.totalorder %s1780_s22, %s2215_s13 }
 0x398   :  { %p1786_p7 = pnand %p1784_p6, %p1781_p5 }
 0x39a   :  { %1789 = shalt.err (!%p1786_p7)
}
 0x39b   :  { %s1793_s26 = smov 128   ;;  %s1794_s27 = smov 8  }
 0x39c   :  { %1311 = dma.vmem_to_hbm [thread:$0]  %s1306_s18, 2048, %s2215_s13, [#allocation3], %s1793_s26, %s1793_s26, %s1794_s27  }
 0x39d   :  { %1790 = dma.done.wait [#allocation3], 2048  }
 0x39e   :  { %1791 = vsyncadd [#allocation3], 4294965248 }
 0x39f   :  { %1315 = vsyncpa [#allocation3], 1 }

</bundles_post_ra>
